<compile_context>
chip_gen: v7x
topology: tpu7x:2x2x1
jax: 0.10.0
libtpu: 0.0.40
codegen_flags: <defaults>
</compile_context>

<pallas_src>
import numpy as np
import jax
import jax.numpy as jnp
from jax.experimental import pallas as pl
from jax.experimental.pallas import tpu as pltpu

# ---- small shapes consistent with the module (defaults scaled down) ----
B = 4               # batch of observations; also the LSTM sequence length in forward()
OBS = 10            # observations_size
HID = 32            # hidden_size
MID = 32            # mid_features_size
LSTM_OBS = 5        # lstm_observations_size
LSTM_HID = 16       # lstm_hidden_size
LSTM_LAYERS = 2     # lstm_num_layers

assert HID == MID, "weight slab lane width assumes HID == MID"


def _align8(n):
    return (n + 7) // 8 * 8


# row offsets inside the packed lane-MID weight slab (w1, w2, ws_mlp, ws_lstm)
_W1_OFF = 0
_W2_OFF = _W1_OFF + _align8(OBS)
_WSM_OFF = _W2_OFF + _align8(HID)
_WSL_OFF = _WSM_OFF + _align8(MID)
_WS_ROWS = _WSL_OFF + _align8(LSTM_HID)

# row offsets inside the packed lane-4H gate-weight slab (wih0, whh0, [wih1; whh1])
_WIH0_OFF = 0
_WHH0_OFF = _WIH0_OFF + _align8(LSTM_OBS)
_W1CAT_OFF = _WHH0_OFF + _align8(LSTM_HID)
_WG_ROWS = _W1CAT_OFF + 2 * LSTM_HID


def fe_kernel(obs_ref, lstm_x_ref, h0_ref, c0_ref,
              wg_ref, ws_ref, b_ref,
              out_ref, h_out_ref, c_out_ref):
    H = LSTM_HID

    # ---- unpack parameter slabs (static, 8-aligned row slices -> plain vlds) ----
    w1 = ws_ref[_W1_OFF:_W1_OFF + OBS, :]            # (OBS, HID)
    w2 = ws_ref[_W2_OFF:_W2_OFF + HID, :]            # (HID, MID)
    ws_mlp = ws_ref[_WSM_OFF:_WSM_OFF + MID, :]      # (MID, MID)
    ws_lstm = ws_ref[_WSL_OFF:_WSL_OFF + H, :]       # (H,   MID)

    wih0 = wg_ref[_WIH0_OFF:_WIH0_OFF + LSTM_OBS, :]   # (LSTM_OBS, 4H)
    whh0 = wg_ref[_WHH0_OFF:_WHH0_OFF + H, :]          # (H, 4H)
    w1cat = wg_ref[_W1CAT_OFF:_W1CAT_OFF + 2 * H, :]   # (2H, 4H) = [Wih1; Whh1]

    b1 = b_ref[0:1, 0:HID]
    b2 = b_ref[1:2, 0:MID]
    b0 = b_ref[2:3, :]                                  # bih0 + bhh0
    b1l = b_ref[3:4, :]                                 # bih1 + bhh1
    bs = b_ref[4:5, 0:MID]

    # ---------------- MLP branch: Linear -> tanh -> Linear -> tanh ----------------
    obs = obs_ref[...]                                                     # (B, OBS)
    a1 = jnp.tanh(jnp.dot(obs, w1, preferred_element_type=jnp.float32) + b1)
    mlp_feats = jnp.tanh(jnp.dot(a1, w2, preferred_element_type=jnp.float32) + b2)
    # mlp half of the summary layer: independent of the recurrence, scheduler hides it
    out_acc = jnp.dot(mlp_feats, ws_mlp, preferred_element_type=jnp.float32) + bs

    # ------------- LSTM branch: 2 layers, batch=1, seq_len = B (eval mode) --------
    # Hoisted layer-0 input projection (off the recurrent critical path), biases folded in:
    xproj0 = (jnp.dot(lstm_x_ref[...], wih0,
                      preferred_element_type=jnp.float32) + b0)            # (T, 4H)

    def activate(gates, c_prev):
        # one sigmoid over the whole (1, 4H) vreg; tanh only on the g slice
        sig = jax.nn.sigmoid(gates)
        i = sig[:, 0 * H:1 * H]
        f = sig[:, 1 * H:2 * H]
        o = sig[:, 3 * H:4 * H]
        g = jnp.tanh(gates[:, 2 * H:3 * H])
        c_new = f * c_prev + i * g
        h_new = o * jnp.tanh(c_new)
        return h_new, c_new

    # initial states in PyTorch layout (num_layers, 1, hidden)
    h_l0 = h0_ref[0]
    h_l1 = h0_ref[1]
    c_l0 = c0_ref[0]
    c_l1 = c0_ref[1]

    # TODO(synk): nn.LSTM's inter-layer dropout(p=0.2) only applies in training mode;
    #             eval/inference semantics (no dropout) are implemented here.
    hs = []
    for t in range(B):                       # static unroll, T = B = 4 (LLO sees across steps)
        # layer 0: hoisted input proj + single recurrent matmul
        g0 = xproj0[t:t + 1, :] + jnp.dot(h_l0, whh0,
                                          preferred_element_type=jnp.float32)
        h_l0, c_l0 = activate(g0, c_l0)
        # layer 1: fused input/recurrent matmul via lane concat
        xh = jnp.concatenate([h_l0, h_l1], axis=1)                         # (1, 2H)
        g1 = jnp.dot(xh, w1cat, preferred_element_type=jnp.float32) + b1l
        h_l1, c_l1 = activate(g1, c_l1)
        hs.append(h_l1)

    lstm_feats = jnp.concatenate(hs, axis=0)                               # (B, H), stays in vregs

    # -------- summary layer: concat(mlp, lstm) -> Linear -> tanh (split weights) --------
    out_ref[...] = jnp.tanh(out_acc + jnp.dot(lstm_feats, ws_lstm,
                                              preferred_element_type=jnp.float32))

    # final (h, c) written directly in PyTorch layout (num_layers, 1, hidden)
    h_out_ref[0] = h_l0
    h_out_ref[1] = h_l1
    c_out_ref[0] = c_l0
    c_out_ref[1] = c_l1


def init_params(key):
    ks = jax.random.split(key, 15)

    def u(k, shape, fan_in):
        bound = 1.0 / np.sqrt(fan_in)
        return jax.random.uniform(k, shape, jnp.float32, -bound, bound)

    p = {}
    # MLP (weights stored transposed: (in, out))
    p["w1"] = u(ks[0], (OBS, HID), OBS)
    p["b1"] = u(ks[1], (1, HID), OBS)
    p["w2"] = u(ks[2], (HID, MID), HID)
    p["b2"] = u(ks[3], (1, MID), HID)
    # LSTM layer 0 (PyTorch gate order [i, f, g, o], weights pre-transposed to (in, 4H))
    p["wih0"] = u(ks[4], (LSTM_OBS, 4 * LSTM_HID), LSTM_HID)
    p["whh0"] = u(ks[5], (LSTM_HID, 4 * LSTM_HID), LSTM_HID)
    p["bih0"] = u(ks[6], (1, 4 * LSTM_HID), LSTM_HID)
    p["bhh0"] = u(ks[7], (1, 4 * LSTM_HID), LSTM_HID)
    # LSTM layer 1
    p["wih1"] = u(ks[8], (LSTM_HID, 4 * LSTM_HID), LSTM_HID)
    p["whh1"] = u(ks[9], (LSTM_HID, 4 * LSTM_HID), LSTM_HID)
    p["bih1"] = u(ks[10], (1, 4 * LSTM_HID), LSTM_HID)
    p["bhh1"] = u(ks[11], (1, 4 * LSTM_HID), LSTM_HID)
    # summary layer: Linear(MID + LSTM_HID -> MID), split into the two concat halves
    p["ws_mlp"] = u(ks[12], (MID, MID), MID + LSTM_HID)
    p["ws_lstm"] = u(ks[13], (LSTM_HID, MID), MID + LSTM_HID)
    p["bs"] = u(ks[14], (1, MID), MID + LSTM_HID)
    return p


def pack_params(p):
    """One-time parameter preprocessing (off the per-call path):
       * biases pre-summed (bih+bhh) and all 5 biases packed into one (8, 4H) slab
       * gate weights (Wih0, Whh0, [Wih1; Whh1]) packed into one lane-4H slab (8-aligned rows)
       * MLP / summary weights packed into one lane-MID slab
       -> 3 weight DMAs instead of 13, and zero per-call XLA preprocessing ops."""
    H = LSTM_HID
    wg = jnp.zeros((_WG_ROWS, 4 * H), jnp.float32)
    wg = wg.at[_WIH0_OFF:_WIH0_OFF + LSTM_OBS].set(p["wih0"])
    wg = wg.at[_WHH0_OFF:_WHH0_OFF + H].set(p["whh0"])
    wg = wg.at[_W1CAT_OFF:_W1CAT_OFF + H].set(p["wih1"])
    wg = wg.at[_W1CAT_OFF + H:_W1CAT_OFF + 2 * H].set(p["whh1"])

    ws = jnp.zeros((_WS_ROWS, MID), jnp.float32)
    ws = ws.at[_W1_OFF:_W1_OFF + OBS].set(p["w1"])
    ws = ws.at[_W2_OFF:_W2_OFF + HID].set(p["w2"])
    ws = ws.at[_WSM_OFF:_WSM_OFF + MID].set(p["ws_mlp"])
    ws = ws.at[_WSL_OFF:_WSL_OFF + H].set(p["ws_lstm"])

    b = jnp.zeros((8, 4 * H), jnp.float32)
    b = b.at[0, 0:HID].set(p["b1"][0])
    b = b.at[1, 0:MID].set(p["b2"][0])
    b = b.at[2].set((p["bih0"] + p["bhh0"])[0])
    b = b.at[3].set((p["bih1"] + p["bhh1"])[0])
    b = b.at[4, 0:MID].set(p["bs"][0])
    return {"wg": wg, "ws": ws, "bias": b}


@jax.jit
def feature_extractor_forward(observations, lstm_observations, lstm_states, packed):
    h0, c0 = lstm_states                                   # each (LSTM_LAYERS, 1, LSTM_HID)
    vmem = pl.BlockSpec(memory_space=pltpu.MemorySpace.VMEM)
    mid, hT, cT = pl.pallas_call(
        fe_kernel,
        out_shape=(jax.ShapeDtypeStruct((B, MID), jnp.float32),
                   jax.ShapeDtypeStruct((LSTM_LAYERS, 1, LSTM_HID), jnp.float32),
                   jax.ShapeDtypeStruct((LSTM_LAYERS, 1, LSTM_HID), jnp.float32)),
        in_specs=[vmem] * 7,
        out_specs=(vmem, vmem, vmem),
    )(observations, lstm_observations, h0, c0,
      packed["wg"], packed["ws"], packed["bias"])
    return mid, (hT, cT)


def ref_forward(observations, lstm_observations, lstm_states, p):
    """Pure-JAX reference mirroring the PyTorch forward (eval mode)."""
    a1 = jnp.tanh(observations @ p["w1"] + p["b1"])
    mlp = jnp.tanh(a1 @ p["w2"] + p["b2"])
    h0, c0 = lstm_states
    h = [h0[l, 0] for l in range(LSTM_LAYERS)]
    c = [c0[l, 0] for l in range(LSTM_LAYERS)]
    layer_params = [(p["wih0"], p["whh0"], p["bih0"], p["bhh0"]),
                    (p["wih1"], p["whh1"], p["bih1"], p["bhh1"])]
    outs = []
    for t in range(B):
        x = lstm_observations[t]
        for l, (wih, whh, bih, bhh) in enumerate(layer_params):
            gates = x @ wih + h[l] @ whh + bih[0] + bhh[0]
            i = jax.nn.sigmoid(gates[0:LSTM_HID])
            f = jax.nn.sigmoid(gates[LSTM_HID:2 * LSTM_HID])
            g = jnp.tanh(gates[2 * LSTM_HID:3 * LSTM_HID])
            o = jax.nn.sigmoid(gates[3 * LSTM_HID:4 * LSTM_HID])
            c[l] = f * c[l] + i * g
            h[l] = o * jnp.tanh(c[l])
            x = h[l]
        outs.append(h[-1])
    lstm_out = jnp.stack(outs)
    out = jnp.tanh(mlp @ p["ws_mlp"] + lstm_out @ p["ws_lstm"] + p["bs"])
    return out, (jnp.stack(h)[:, None, :], jnp.stack(c)[:, None, :])


if __name__ == "__main__":
    key = jax.random.PRNGKey(0)
    k_obs, k_lstm, k_h, k_c, k_params = jax.random.split(key, 5)

    observations = jax.random.normal(k_obs, (B, OBS), jnp.float32)
    lstm_observations = jax.random.normal(k_lstm, (B, LSTM_OBS), jnp.float32)
    # create_initial_lstm_state gives zeros; use non-zero carried states to exercise state handling
    lstm_states = (0.1 * jax.random.normal(k_h, (LSTM_LAYERS, 1, LSTM_HID), jnp.float32),
                   0.1 * jax.random.normal(k_c, (LSTM_LAYERS, 1, LSTM_HID), jnp.float32))
    params = init_params(k_params)
    packed = pack_params(params)            # one-time preprocessing, off the per-call path

    mid, (hT, cT) = feature_extractor_forward(observations, lstm_observations,
                                              lstm_states, packed)
    jax.block_until_ready((mid, hT, cT))

    mid_ref, (hT_ref, cT_ref) = ref_forward(observations, lstm_observations,
                                            lstm_states, params)
    np.testing.assert_allclose(np.asarray(mid), np.asarray(mid_ref), rtol=1e-5, atol=1e-5)
    np.testing.assert_allclose(np.asarray(hT), np.asarray(hT_ref), rtol=1e-5, atol=1e-5)
    np.testing.assert_allclose(np.asarray(cT), np.asarray(cT_ref), rtol=1e-5, atol=1e-5)

    print("KERNEL_OK")
</pallas_src>

<mosaic_0001>
module attributes {stable_mosaic.version = 11 : i64} {
  func.func @fe_kernel(%arg0: memref<4x10xf32, #tpu.memory_space<vmem>>, %arg1: memref<4x5xf32, #tpu.memory_space<vmem>>, %arg2: memref<2x1x16xf32, #tpu.memory_space<vmem>>, %arg3: memref<2x1x16xf32, #tpu.memory_space<vmem>>, %arg4: memref<56x64xf32, #tpu.memory_space<vmem>>, %arg5: memref<96x32xf32, #tpu.memory_space<vmem>>, %arg6: memref<8x64xf32, #tpu.memory_space<vmem>>, %arg7: memref<4x32xf32, #tpu.memory_space<vmem>>, %arg8: memref<2x1x16xf32, #tpu.memory_space<vmem>>, %arg9: memref<2x1x16xf32, #tpu.memory_space<vmem>>) attributes {dimension_semantics = [], scalar_prefetch = 0 : i64, scratch_operands = 0 : i64, tpu.core_type = #tpu.core_type<tc>} {
    %c0 = arith.constant 0 : index
    %c0_0 = arith.constant 0 : index
    %0 = vector.load %arg5[%c0, %c0_0] : memref<96x32xf32, #tpu.memory_space<vmem>>, vector<10x32xf32>
    %c16 = arith.constant 16 : index
    %c0_1 = arith.constant 0 : index
    %1 = vector.load %arg5[%c16, %c0_1] : memref<96x32xf32, #tpu.memory_space<vmem>>, vector<32x32xf32>
    %c48 = arith.constant 48 : index
    %c0_2 = arith.constant 0 : index
    %2 = vector.load %arg5[%c48, %c0_2] : memref<96x32xf32, #tpu.memory_space<vmem>>, vector<32x32xf32>
    %c80 = arith.constant 80 : index
    %c0_3 = arith.constant 0 : index
    %3 = vector.load %arg5[%c80, %c0_3] : memref<96x32xf32, #tpu.memory_space<vmem>>, vector<16x32xf32>
    %c0_4 = arith.constant 0 : index
    %c0_5 = arith.constant 0 : index
    %4 = vector.load %arg4[%c0_4, %c0_5] : memref<56x64xf32, #tpu.memory_space<vmem>>, vector<5x64xf32>
    %c8 = arith.constant 8 : index
    %c0_6 = arith.constant 0 : index
    %5 = vector.load %arg4[%c8, %c0_6] : memref<56x64xf32, #tpu.memory_space<vmem>>, vector<16x64xf32>
    %c24 = arith.constant 24 : index
    %c0_7 = arith.constant 0 : index
    %6 = vector.load %arg4[%c24, %c0_7] : memref<56x64xf32, #tpu.memory_space<vmem>>, vector<32x64xf32>
    %c0_8 = arith.constant 0 : index
    %c0_9 = arith.constant 0 : index
    %7 = vector.load %arg6[%c0_8, %c0_9] : memref<8x64xf32, #tpu.memory_space<vmem>>, vector<1x32xf32>
    %c1 = arith.constant 1 : index
    %c0_10 = arith.constant 0 : index
    %8 = vector.load %arg6[%c1, %c0_10] : memref<8x64xf32, #tpu.memory_space<vmem>>, vector<1x32xf32>
    %c2 = arith.constant 2 : index
    %c0_11 = arith.constant 0 : index
    %9 = vector.load %arg6[%c2, %c0_11] : memref<8x64xf32, #tpu.memory_space<vmem>>, vector<1x64xf32>
    %c3 = arith.constant 3 : index
    %c0_12 = arith.constant 0 : index
    %10 = vector.load %arg6[%c3, %c0_12] : memref<8x64xf32, #tpu.memory_space<vmem>>, vector<1x64xf32>
    %c4 = arith.constant 4 : index
    %c0_13 = arith.constant 0 : index
    %11 = vector.load %arg6[%c4, %c0_13] : memref<8x64xf32, #tpu.memory_space<vmem>>, vector<1x32xf32>
    %c0_14 = arith.constant 0 : index
    %c0_15 = arith.constant 0 : index
    %12 = vector.load %arg0[%c0_14, %c0_15] : memref<4x10xf32, #tpu.memory_space<vmem>>, vector<4x10xf32>
    %cst = arith.constant dense<0.000000e+00> : vector<4x32xf32>
    %13 = tpu.matmul %12, %0, %cst {dimension_numbers = #tpu.dot_dimension_numbers<[1], [0], [0], [1], [0, 0, 1, 1], [], []>} : vector<4x10xf32>, vector<10x32xf32>, vector<4x32xf32> -> vector<4x32xf32>
    %14 = vector.broadcast %7 : vector<1x32xf32> to vector<4x32xf32>
    %15 = arith.addf %13, %14 : vector<4x32xf32>
    %16 = math.tanh %15 : vector<4x32xf32>
    %cst_16 = arith.constant dense<0.000000e+00> : vector<4x32xf32>
    %17 = tpu.matmul %16, %1, %cst_16 {dimension_numbers = #tpu.dot_dimension_numbers<[1], [0], [0], [1], [0, 0, 1, 1], [], []>} : vector<4x32xf32>, vector<32x32xf32>, vector<4x32xf32> -> vector<4x32xf32>
    %18 = vector.broadcast %8 : vector<1x32xf32> to vector<4x32xf32>
    %19 = arith.addf %17, %18 : vector<4x32xf32>
    %20 = math.tanh %19 : vector<4x32xf32>
    %cst_17 = arith.constant dense<0.000000e+00> : vector<4x32xf32>
    %21 = tpu.matmul %20, %2, %cst_17 {dimension_numbers = #tpu.dot_dimension_numbers<[1], [0], [0], [1], [0, 0, 1, 1], [], []>} : vector<4x32xf32>, vector<32x32xf32>, vector<4x32xf32> -> vector<4x32xf32>
    %22 = vector.broadcast %11 : vector<1x32xf32> to vector<4x32xf32>
    %23 = arith.addf %21, %22 : vector<4x32xf32>
    %c0_18 = arith.constant 0 : index
    %c0_19 = arith.constant 0 : index
    %24 = vector.load %arg1[%c0_18, %c0_19] : memref<4x5xf32, #tpu.memory_space<vmem>>, vector<4x5xf32>
    %cst_20 = arith.constant dense<0.000000e+00> : vector<4x64xf32>
    %25 = tpu.matmul %24, %4, %cst_20 {dimension_numbers = #tpu.dot_dimension_numbers<[1], [0], [0], [1], [0, 0, 1, 1], [], []>} : vector<4x5xf32>, vector<5x64xf32>, vector<4x64xf32> -> vector<4x64xf32>
    %26 = vector.broadcast %9 : vector<1x64xf32> to vector<4x64xf32>
    %27 = arith.addf %25, %26 : vector<4x64xf32>
    %c0_21 = arith.constant 0 : index
    %c0_22 = arith.constant 0 : index
    %c0_23 = arith.constant 0 : index
    %28 = vector.load %arg2[%c0_21, %c0_22, %c0_23] : memref<2x1x16xf32, #tpu.memory_space<vmem>>, vector<1x1x16xf32>
    %29 = vector.shape_cast %28 : vector<1x1x16xf32> to vector<1x16xf32>
    %c1_24 = arith.constant 1 : index
    %c0_25 = arith.constant 0 : index
    %c0_26 = arith.constant 0 : index
    %30 = vector.load %arg2[%c1_24, %c0_25, %c0_26] : memref<2x1x16xf32, #tpu.memory_space<vmem>>, vector<1x1x16xf32>
    %31 = vector.shape_cast %30 : vector<1x1x16xf32> to vector<1x16xf32>
    %c0_27 = arith.constant 0 : index
    %c0_28 = arith.constant 0 : index
    %c0_29 = arith.constant 0 : index
    %32 = vector.load %arg3[%c0_27, %c0_28, %c0_29] : memref<2x1x16xf32, #tpu.memory_space<vmem>>, vector<1x1x16xf32>
    %33 = vector.shape_cast %32 : vector<1x1x16xf32> to vector<1x16xf32>
    %c1_30 = arith.constant 1 : index
    %c0_31 = arith.constant 0 : index
    %c0_32 = arith.constant 0 : index
    %34 = vector.load %arg3[%c1_30, %c0_31, %c0_32] : memref<2x1x16xf32, #tpu.memory_space<vmem>>, vector<1x1x16xf32>
    %35 = vector.shape_cast %34 : vector<1x1x16xf32> to vector<1x16xf32>
    %36 = vector.extract_strided_slice %27 {offsets = [0, 0], sizes = [1, 64], strides = [1, 1]} : vector<4x64xf32> to vector<1x64xf32>
    %cst_33 = arith.constant dense<0.000000e+00> : vector<1x64xf32>
    %37 = tpu.matmul %29, %5, %cst_33 {dimension_numbers = #tpu.dot_dimension_numbers<[1], [0], [0], [1], [0, 0, 1, 1], [], []>} : vector<1x16xf32>, vector<16x64xf32>, vector<1x64xf32> -> vector<1x64xf32>
    %38 = arith.addf %36, %37 : vector<1x64xf32>
    %39 = arith.negf %38 : vector<1x64xf32>
    %40 = math.exp %39 : vector<1x64xf32>
    %cst_34 = arith.constant 1.000000e+00 : f32
    %41 = vector.broadcast %cst_34 : f32 to vector<1x64xf32>
    %42 = arith.addf %41, %40 : vector<1x64xf32>
    %43 = arith.divf %41, %42 : vector<1x64xf32>
    %44 = vector.extract_strided_slice %43 {offsets = [0, 0], sizes = [1, 16], strides = [1, 1]} : vector<1x64xf32> to vector<1x16xf32>
    %45 = vector.extract_strided_slice %43 {offsets = [0, 16], sizes = [1, 16], strides = [1, 1]} : vector<1x64xf32> to vector<1x16xf32>
    %46 = vector.extract_strided_slice %43 {offsets = [0, 48], sizes = [1, 16], strides = [1, 1]} : vector<1x64xf32> to vector<1x16xf32>
    %47 = vector.extract_strided_slice %38 {offsets = [0, 32], sizes = [1, 16], strides = [1, 1]} : vector<1x64xf32> to vector<1x16xf32>
    %48 = math.tanh %47 : vector<1x16xf32>
    %49 = arith.mulf %45, %33 : vector<1x16xf32>
    %50 = arith.mulf %44, %48 : vector<1x16xf32>
    %51 = arith.addf %49, %50 : vector<1x16xf32>
    %52 = math.tanh %51 : vector<1x16xf32>
    %53 = arith.mulf %46, %52 : vector<1x16xf32>
    %54 = tpu.concatenate %53, %31 in 1 : vector<1x16xf32>, vector<1x16xf32> -> vector<1x32xf32>
    %cst_35 = arith.constant dense<0.000000e+00> : vector<1x64xf32>
    %55 = tpu.matmul %54, %6, %cst_35 {dimension_numbers = #tpu.dot_dimension_numbers<[1], [0], [0], [1], [0, 0, 1, 1], [], []>} : vector<1x32xf32>, vector<32x64xf32>, vector<1x64xf32> -> vector<1x64xf32>
    %56 = arith.addf %55, %10 : vector<1x64xf32>
    %57 = arith.negf %56 : vector<1x64xf32>
    %58 = math.exp %57 : vector<1x64xf32>
    %cst_36 = arith.constant 1.000000e+00 : f32
    %59 = vector.broadcast %cst_36 : f32 to vector<1x64xf32>
    %60 = arith.addf %59, %58 : vector<1x64xf32>
    %61 = arith.divf %59, %60 : vector<1x64xf32>
    %62 = vector.extract_strided_slice %61 {offsets = [0, 0], sizes = [1, 16], strides = [1, 1]} : vector<1x64xf32> to vector<1x16xf32>
    %63 = vector.extract_strided_slice %61 {offsets = [0, 16], sizes = [1, 16], strides = [1, 1]} : vector<1x64xf32> to vector<1x16xf32>
    %64 = vector.extract_strided_slice %61 {offsets = [0, 48], sizes = [1, 16], strides = [1, 1]} : vector<1x64xf32> to vector<1x16xf32>
    %65 = vector.extract_strided_slice %56 {offsets = [0, 32], sizes = [1, 16], strides = [1, 1]} : vector<1x64xf32> to vector<1x16xf32>
    %66 = math.tanh %65 : vector<1x16xf32>
    %67 = arith.mulf %63, %35 : vector<1x16xf32>
    %68 = arith.mulf %62, %66 : vector<1x16xf32>
    %69 = arith.addf %67, %68 : vector<1x16xf32>
    %70 = math.tanh %69 : vector<1x16xf32>
    %71 = arith.mulf %64, %70 : vector<1x16xf32>
    %72 = vector.extract_strided_slice %27 {offsets = [1, 0], sizes = [1, 64], strides = [1, 1]} : vector<4x64xf32> to vector<1x64xf32>
    %cst_37 = arith.constant dense<0.000000e+00> : vector<1x64xf32>
    %73 = tpu.matmul %53, %5, %cst_37 {dimension_numbers = #tpu.dot_dimension_numbers<[1], [0], [0], [1], [0, 0, 1, 1], [], []>} : vector<1x16xf32>, vector<16x64xf32>, vector<1x64xf32> -> vector<1x64xf32>
    %74 = arith.addf %72, %73 : vector<1x64xf32>
    %75 = arith.negf %74 : vector<1x64xf32>
    %76 = math.exp %75 : vector<1x64xf32>
    %cst_38 = arith.constant 1.000000e+00 : f32
    %77 = vector.broadcast %cst_38 : f32 to vector<1x64xf32>
    %78 = arith.addf %77, %76 : vector<1x64xf32>
    %79 = arith.divf %77, %78 : vector<1x64xf32>
    %80 = vector.extract_strided_slice %79 {offsets = [0, 0], sizes = [1, 16], strides = [1, 1]} : vector<1x64xf32> to vector<1x16xf32>
    %81 = vector.extract_strided_slice %79 {offsets = [0, 16], sizes = [1, 16], strides = [1, 1]} : vector<1x64xf32> to vector<1x16xf32>
    %82 = vector.extract_strided_slice %79 {offsets = [0, 48], sizes = [1, 16], strides = [1, 1]} : vector<1x64xf32> to vector<1x16xf32>
    %83 = vector.extract_strided_slice %74 {offsets = [0, 32], sizes = [1, 16], strides = [1, 1]} : vector<1x64xf32> to vector<1x16xf32>
    %84 = math.tanh %83 : vector<1x16xf32>
    %85 = arith.mulf %81, %51 : vector<1x16xf32>
    %86 = arith.mulf %80, %84 : vector<1x16xf32>
    %87 = arith.addf %85, %86 : vector<1x16xf32>
    %88 = math.tanh %87 : vector<1x16xf32>
    %89 = arith.mulf %82, %88 : vector<1x16xf32>
    %90 = tpu.concatenate %89, %71 in 1 : vector<1x16xf32>, vector<1x16xf32> -> vector<1x32xf32>
    %cst_39 = arith.constant dense<0.000000e+00> : vector<1x64xf32>
    %91 = tpu.matmul %90, %6, %cst_39 {dimension_numbers = #tpu.dot_dimension_numbers<[1], [0], [0], [1], [0, 0, 1, 1], [], []>} : vector<1x32xf32>, vector<32x64xf32>, vector<1x64xf32> -> vector<1x64xf32>
    %92 = arith.addf %91, %10 : vector<1x64xf32>
    %93 = arith.negf %92 : vector<1x64xf32>
    %94 = math.exp %93 : vector<1x64xf32>
    %cst_40 = arith.constant 1.000000e+00 : f32
    %95 = vector.broadcast %cst_40 : f32 to vector<1x64xf32>
    %96 = arith.addf %95, %94 : vector<1x64xf32>
    %97 = arith.divf %95, %96 : vector<1x64xf32>
    %98 = vector.extract_strided_slice %97 {offsets = [0, 0], sizes = [1, 16], strides = [1, 1]} : vector<1x64xf32> to vector<1x16xf32>
    %99 = vector.extract_strided_slice %97 {offsets = [0, 16], sizes = [1, 16], strides = [1, 1]} : vector<1x64xf32> to vector<1x16xf32>
    %100 = vector.extract_strided_slice %97 {offsets = [0, 48], sizes = [1, 16], strides = [1, 1]} : vector<1x64xf32> to vector<1x16xf32>
    %101 = vector.extract_strided_slice %92 {offsets = [0, 32], sizes = [1, 16], strides = [1, 1]} : vector<1x64xf32> to vector<1x16xf32>
    %102 = math.tanh %101 : vector<1x16xf32>
    %103 = arith.mulf %99, %69 : vector<1x16xf32>
    %104 = arith.mulf %98, %102 : vector<1x16xf32>
    %105 = arith.addf %103, %104 : vector<1x16xf32>
    %106 = math.tanh %105 : vector<1x16xf32>
    %107 = arith.mulf %100, %106 : vector<1x16xf32>
    %108 = vector.extract_strided_slice %27 {offsets = [2, 0], sizes = [1, 64], strides = [1, 1]} : vector<4x64xf32> to vector<1x64xf32>
    %cst_41 = arith.constant dense<0.000000e+00> : vector<1x64xf32>
    %109 = tpu.matmul %89, %5, %cst_41 {dimension_numbers = #tpu.dot_dimension_numbers<[1], [0], [0], [1], [0, 0, 1, 1], [], []>} : vector<1x16xf32>, vector<16x64xf32>, vector<1x64xf32> -> vector<1x64xf32>
    %110 = arith.addf %108, %109 : vector<1x64xf32>
    %111 = arith.negf %110 : vector<1x64xf32>
    %112 = math.exp %111 : vector<1x64xf32>
    %cst_42 = arith.constant 1.000000e+00 : f32
    %113 = vector.broadcast %cst_42 : f32 to vector<1x64xf32>
    %114 = arith.addf %113, %112 : vector<1x64xf32>
    %115 = arith.divf %113, %114 : vector<1x64xf32>
    %116 = vector.extract_strided_slice %115 {offsets = [0, 0], sizes = [1, 16], strides = [1, 1]} : vector<1x64xf32> to vector<1x16xf32>
    %117 = vector.extract_strided_slice %115 {offsets = [0, 16], sizes = [1, 16], strides = [1, 1]} : vector<1x64xf32> to vector<1x16xf32>
    %118 = vector.extract_strided_slice %115 {offsets = [0, 48], sizes = [1, 16], strides = [1, 1]} : vector<1x64xf32> to vector<1x16xf32>
    %119 = vector.extract_strided_slice %110 {offsets = [0, 32], sizes = [1, 16], strides = [1, 1]} : vector<1x64xf32> to vector<1x16xf32>
    %120 = math.tanh %119 : vector<1x16xf32>
    %121 = arith.mulf %117, %87 : vector<1x16xf32>
    %122 = arith.mulf %116, %120 : vector<1x16xf32>
    %123 = arith.addf %121, %122 : vector<1x16xf32>
    %124 = math.tanh %123 : vector<1x16xf32>
    %125 = arith.mulf %118, %124 : vector<1x16xf32>
    %126 = tpu.concatenate %125, %107 in 1 : vector<1x16xf32>, vector<1x16xf32> -> vector<1x32xf32>
    %cst_43 = arith.constant dense<0.000000e+00> : vector<1x64xf32>
    %127 = tpu.matmul %126, %6, %cst_43 {dimension_numbers = #tpu.dot_dimension_numbers<[1], [0], [0], [1], [0, 0, 1, 1], [], []>} : vector<1x32xf32>, vector<32x64xf32>, vector<1x64xf32> -> vector<1x64xf32>
    %128 = arith.addf %127, %10 : vector<1x64xf32>
    %129 = arith.negf %128 : vector<1x64xf32>
    %130 = math.exp %129 : vector<1x64xf32>
    %cst_44 = arith.constant 1.000000e+00 : f32
    %131 = vector.broadcast %cst_44 : f32 to vector<1x64xf32>
    %132 = arith.addf %131, %130 : vector<1x64xf32>
    %133 = arith.divf %131, %132 : vector<1x64xf32>
    %134 = vector.extract_strided_slice %133 {offsets = [0, 0], sizes = [1, 16], strides = [1, 1]} : vector<1x64xf32> to vector<1x16xf32>
    %135 = vector.extract_strided_slice %133 {offsets = [0, 16], sizes = [1, 16], strides = [1, 1]} : vector<1x64xf32> to vector<1x16xf32>
    %136 = vector.extract_strided_slice %133 {offsets = [0, 48], sizes = [1, 16], strides = [1, 1]} : vector<1x64xf32> to vector<1x16xf32>
    %137 = vector.extract_strided_slice %128 {offsets = [0, 32], sizes = [1, 16], strides = [1, 1]} : vector<1x64xf32> to vector<1x16xf32>
    %138 = math.tanh %137 : vector<1x16xf32>
    %139 = arith.mulf %135, %105 : vector<1x16xf32>
    %140 = arith.mulf %134, %138 : vector<1x16xf32>
    %141 = arith.addf %139, %140 : vector<1x16xf32>
    %142 = math.tanh %141 : vector<1x16xf32>
    %143 = arith.mulf %136, %142 : vector<1x16xf32>
    %144 = vector.extract_strided_slice %27 {offsets = [3, 0], sizes = [1, 64], strides = [1, 1]} : vector<4x64xf32> to vector<1x64xf32>
    %cst_45 = arith.constant dense<0.000000e+00> : vector<1x64xf32>
    %145 = tpu.matmul %125, %5, %cst_45 {dimension_numbers = #tpu.dot_dimension_numbers<[1], [0], [0], [1], [0, 0, 1, 1], [], []>} : vector<1x16xf32>, vector<16x64xf32>, vector<1x64xf32> -> vector<1x64xf32>
    %146 = arith.addf %144, %145 : vector<1x64xf32>
    %147 = arith.negf %146 : vector<1x64xf32>
    %148 = math.exp %147 : vector<1x64xf32>
    %cst_46 = arith.constant 1.000000e+00 : f32
    %149 = vector.broadcast %cst_46 : f32 to vector<1x64xf32>
    %150 = arith.addf %149, %148 : vector<1x64xf32>
    %151 = arith.divf %149, %150 : vector<1x64xf32>
    %152 = vector.extract_strided_slice %151 {offsets = [0, 0], sizes = [1, 16], strides = [1, 1]} : vector<1x64xf32> to vector<1x16xf32>
    %153 = vector.extract_strided_slice %151 {offsets = [0, 16], sizes = [1, 16], strides = [1, 1]} : vector<1x64xf32> to vector<1x16xf32>
    %154 = vector.extract_strided_slice %151 {offsets = [0, 48], sizes = [1, 16], strides = [1, 1]} : vector<1x64xf32> to vector<1x16xf32>
    %155 = vector.extract_strided_slice %146 {offsets = [0, 32], sizes = [1, 16], strides = [1, 1]} : vector<1x64xf32> to vector<1x16xf32>
    %156 = math.tanh %155 : vector<1x16xf32>
    %157 = arith.mulf %153, %123 : vector<1x16xf32>
    %158 = arith.mulf %152, %156 : vector<1x16xf32>
    %159 = arith.addf %157, %158 : vector<1x16xf32>
    %160 = math.tanh %159 : vector<1x16xf32>
    %161 = arith.mulf %154, %160 : vector<1x16xf32>
    %162 = tpu.concatenate %161, %143 in 1 : vector<1x16xf32>, vector<1x16xf32> -> vector<1x32xf32>
    %cst_47 = arith.constant dense<0.000000e+00> : vector<1x64xf32>
    %163 = tpu.matmul %162, %6, %cst_47 {dimension_numbers = #tpu.dot_dimension_numbers<[1], [0], [0], [1], [0, 0, 1, 1], [], []>} : vector<1x32xf32>, vector<32x64xf32>, vector<1x64xf32> -> vector<1x64xf32>
    %164 = arith.addf %163, %10 : vector<1x64xf32>
    %165 = arith.negf %164 : vector<1x64xf32>
    %166 = math.exp %165 : vector<1x64xf32>
    %cst_48 = arith.constant 1.000000e+00 : f32
    %167 = vector.broadcast %cst_48 : f32 to vector<1x64xf32>
    %168 = arith.addf %167, %166 : vector<1x64xf32>
    %169 = arith.divf %167, %168 : vector<1x64xf32>
    %170 = vector.extract_strided_slice %169 {offsets = [0, 0], sizes = [1, 16], strides = [1, 1]} : vector<1x64xf32> to vector<1x16xf32>
    %171 = vector.extract_strided_slice %169 {offsets = [0, 16], sizes = [1, 16], strides = [1, 1]} : vector<1x64xf32> to vector<1x16xf32>
    %172 = vector.extract_strided_slice %169 {offsets = [0, 48], sizes = [1, 16], strides = [1, 1]} : vector<1x64xf32> to vector<1x16xf32>
    %173 = vector.extract_strided_slice %164 {offsets = [0, 32], sizes = [1, 16], strides = [1, 1]} : vector<1x64xf32> to vector<1x16xf32>
    %174 = math.tanh %173 : vector<1x16xf32>
    %175 = arith.mulf %171, %141 : vector<1x16xf32>
    %176 = arith.mulf %170, %174 : vector<1x16xf32>
    %177 = arith.addf %175, %176 : vector<1x16xf32>
    %178 = math.tanh %177 : vector<1x16xf32>
    %179 = arith.mulf %172, %178 : vector<1x16xf32>
    %180 = tpu.concatenate %71, %107, %143, %179 in 0 : vector<1x16xf32>, vector<1x16xf32>, vector<1x16xf32>, vector<1x16xf32> -> vector<4x16xf32>
    %cst_49 = arith.constant dense<0.000000e+00> : vector<4x32xf32>
    %181 = tpu.matmul %180, %3, %cst_49 {dimension_numbers = #tpu.dot_dimension_numbers<[1], [0], [0], [1], [0, 0, 1, 1], [], []>} : vector<4x16xf32>, vector<16x32xf32>, vector<4x32xf32> -> vector<4x32xf32>
    %182 = arith.addf %23, %181 : vector<4x32xf32>
    %183 = math.tanh %182 : vector<4x32xf32>
    %c0_50 = arith.constant 0 : index
    %c0_51 = arith.constant 0 : index
    %184 = vector.load %arg7[%c0_50, %c0_51] : memref<4x32xf32, #tpu.memory_space<vmem>>, vector<4x32xf32>
    tpu.vector_store %arg7[%c0_50, %c0_51], %183 {strides = array<i32>} : memref<4x32xf32, #tpu.memory_space<vmem>>, vector<4x32xf32>,
    %c0_52 = arith.constant 0 : index
    %c0_53 = arith.constant 0 : index
    %c0_54 = arith.constant 0 : index
    %185 = vector.load %arg8[%c0_52, %c0_53, %c0_54] : memref<2x1x16xf32, #tpu.memory_space<vmem>>, vector<1x1x16xf32>
    %186 = vector.shape_cast %185 : vector<1x1x16xf32> to vector<1x16xf32>
    %187 = vector.shape_cast %161 : vector<1x16xf32> to vector<1x1x16xf32>
    tpu.vector_store %arg8[%c0_52, %c0_53, %c0_54], %187 {strides = array<i32>} : memref<2x1x16xf32, #tpu.memory_space<vmem>>, vector<1x1x16xf32>,
    %c1_55 = arith.constant 1 : index
    %c0_56 = arith.constant 0 : index
    %c0_57 = arith.constant 0 : index
    %188 = vector.load %arg8[%c1_55, %c0_56, %c0_57] : memref<2x1x16xf32, #tpu.memory_space<vmem>>, vector<1x1x16xf32>
    %189 = vector.shape_cast %188 : vector<1x1x16xf32> to vector<1x16xf32>
    %190 = vector.shape_cast %179 : vector<1x16xf32> to vector<1x1x16xf32>
    tpu.vector_store %arg8[%c1_55, %c0_56, %c0_57], %190 {strides = array<i32>} : memref<2x1x16xf32, #tpu.memory_space<vmem>>, vector<1x1x16xf32>,
    %c0_58 = arith.constant 0 : index
    %c0_59 = arith.constant 0 : index
    %c0_60 = arith.constant 0 : index
    %191 = vector.load %arg9[%c0_58, %c0_59, %c0_60] : memref<2x1x16xf32, #tpu.memory_space<vmem>>, vector<1x1x16xf32>
    %192 = vector.shape_cast %191 : vector<1x1x16xf32> to vector<1x16xf32>
    %193 = vector.shape_cast %159 : vector<1x16xf32> to vector<1x1x16xf32>
    tpu.vector_store %arg9[%c0_58, %c0_59, %c0_60], %193 {strides = array<i32>} : memref<2x1x16xf32, #tpu.memory_space<vmem>>, vector<1x1x16xf32>,
    %c1_61 = arith.constant 1 : index
    %c0_62 = arith.constant 0 : index
    %c0_63 = arith.constant 0 : index
    %194 = vector.load %arg9[%c1_61, %c0_62, %c0_63] : memref<2x1x16xf32, #tpu.memory_space<vmem>>, vector<1x1x16xf32>
    %195 = vector.shape_cast %194 : vector<1x1x16xf32> to vector<1x16xf32>
    %196 = vector.shape_cast %177 : vector<1x16xf32> to vector<1x1x16xf32>
    tpu.vector_store %arg9[%c1_61, %c0_62, %c0_63], %196 {strides = array<i32>} : memref<2x1x16xf32, #tpu.memory_space<vmem>>, vector<1x1x16xf32>,
    return
  }
}

</mosaic_0001>

<bundles_post_ra>
// kernel: feature_extractor_forward.1
= control target key start
LH: loop header
LB: loop body
LE: loop exit
PB: predicated region body
PF: predicated region fallthrough
CT: control target
= control target key end

     0   :  { %15 = vsyncpa [#allocation3], 0  ;;  %vm64_vm0 = vcmask 1041408   ;;  %v1809_v2 = vmov 0.0|0.0   ;;  %vm1810_vm1 = vmmov 1   ;;  %vm1811_vm3 = vmmov 0   ;;  %s2158_s0 = inlined_call_operand.vmem [shape: f32[4,10], index: 0, kind: input, shape index: {}]   ;;  %s2159_s1 = inlined_call_operand.vmem [shape: f32[4,5], index: 1, kind: input, shape index: {}]   ;;  %s2160_s2 = inlined_call_operand.vmem [shape: f32[2,1,16], index: 2, kind: input, shape index: {}]   ;;  %s2161_s3 = inlined_call_operand.vmem [shape: f32[2,1,16], index: 3, kind: input, shape index: {}]   ;;  %s2162_s4 = inlined_call_operand.vmem [shape: f32[56,64], index: 4, kind: input, shape index: {}]   ;;  %s2163_s5 = inlined_call_operand.vmem [shape: f32[96,32], index: 5, kind: input, shape index: {}]   ;;  %s2164_s6 = inlined_call_operand.vmem [shape: f32[8,64], index: 6, kind: input, shape index: {}]   ;;  %s2165_s7 = inlined_call_operand.hbm [shape: f32[4,32], index: 7, kind: output, shape index: {0}]   ;;  %s2166_s8 = inlined_call_operand.hbm [shape: f32[2,1,16], index: 8, kind: output, shape index: {1}]   ;;  %s2167_s9 = inlined_call_operand.hbm [shape: f32[2,1,16], index: 9, kind: output, shape index: {2}]  }
   0x1   :  { %v31_v0 = vld [vmem:[%s2163_s5] sm:$0xff]  ;;  %v32_v1 = vld [vmem:[%s2163_s5 + $0x8] sm:$0x3]  ;;  %1598 = vmatprep.subr.bf16.mxu1 %v1809_v2  ;;  %vm1600_vm2 = vmpackc.low %vm64_vm0, %vm1810_vm1  ;;  %1608 = vmatprep.subr.bf16.mxu0 %v1809_v2  ;;  %v1812_v4 = vmov 0.0  }
   0x2   :  { %v1599_v3 = vpack.c.bf16 %v32_v1, %v31_v0  ;;  %1489 = vmatprep.mubr.msk.f32.mxu1 %vm1811_vm3, %v1812_v4  ;;  %1511 = vmatprep.mubr.msk.f32.mxu0 %vm1811_vm3, %v1812_v4 }
   0x3   :  { %16 = vsyncpa [#allocation5], 0  ;;  %v55_v5 = vld [vmem:[%s2158_s0] sm:$0xf]  ;;  %vm60_vm4 = vcmask 80896   ;;  %v33_v6 = vld [vmem:[%s2163_s5 + $0x10] sm:$0xff] }
   0x4   :  { %1601 = vmatpush3.bf16.msk.msra.mxu1 %vm1600_vm2, %v1599_v3  ;;  %v34_v7 = vld [vmem:[%s2163_s5 + $0x18] sm:$0xff]  ;;  %v35_v8 = vld [vmem:[%s2163_s5 + $0x20] sm:$0xff]  ;;  %v36_v10 = vld [vmem:[%s2163_s5 + $0x28] sm:$0xff]  ;;  %vm143_vm5 = vcmask 261120   ;;  %vm304_vm6 = vcmask 1044480   ;;  %vm300_vm7 = vcmask 39936  }
   0x5   :  { %1602 = vmatprep.subr.bf16.mxu1 %v1809_v2  ;;  %v1603_v9 = vpack.c.bf16 %v34_v7, %v33_v6  ;;  %v1606_v11 = vpack.c.bf16 %v36_v10, %v35_v8  ;;  %v1403_v12 = vld [vmem:[%s2164_s6] ss:$0 sm:$0xff]  ;;  %v37_v17 = vld [vmem:[%s2163_s5 + $0x30] sm:$0xff]  ;;  %v38_v18 = vld [vmem:[%s2163_s5 + $0x38] sm:$0xff]  ;;  %vm384_vm8 = vcmask 130048   ;;  %s1813_s23 = smov 96  }
   0x6   :  { %v39_v19 = vld [vmem:[%s2163_s5 + $0x40] sm:$0xff]  ;;  %v1609_v20 = vpack.c.bf16 %v38_v18, %v37_v17  ;;  %v40_v21 = vld [vmem:[%s2163_s5 + $0x48] sm:$0xff]  ;;  %v45_v30 = vld [vmem:[%s2162_s4 + $0x10] sm:$0xff]  ;;  %s1814_s26 = smov 16   ;;  %s1815_s14 = smov 32   ;;  %vm1255_vm9 = vcmask 1040384  }
   0x7   :  { %1490 = vmatmul.mubr.msk.f32.vlgmr.msra.gmra.mrb[0].mxu1 %vm60_vm4, %v55_v5  ;;  %v43_v22 = vld [vmem:[%s2162_s4] sm:$0x1f]  ;;  %v1612_v23 = vpack.c.bf16 %v40_v21, %v39_v19  ;;  %v44_v29 = vld [vmem:[%s2162_s4 + $0x8] sm:$0xff]  ;;  %v46_v53 = vld [vmem:[%s2162_s4 + $0x18] sm:$0xff]  ;;  %vm1339_vm10 = vcmask 125955   ;;  %vm1258_vm11 = vcmask 1042432  }
   0x8   :  { %1500 = vmatprep.mubr.msk.f32.mxu1 %vm1811_vm3, %v1812_v4  ;;  %1604 = vmatpush3.bf16.msra.mxu1 %v1603_v9  ;;  %v295_v24 = vld [vmem:[%s2159_s1] sm:$0xf]  ;;  %v1943_v31 = vpack.c.bf16 %v45_v30, %v44_v29  ;;  %v48_v55 = vld [vmem:[%s2162_s4 + $0x28] sm:$0xff]  ;;  %v49_v57 = vld [vmem:[%s2162_s4 + $0x30] sm:$0xff]  ;;  %s1817_s21 = smov 112   ;;  %vm1345_vm12 = vcmask 122880  }
   0x9   :  { %1605 = vmatprep.subr.bf16.mxu1 %v1809_v2  ;;  %1610 = vmatpush3.bf16.msra.mxu0 %v1609_v20  ;;  %v1406_v25 = vld [vmem:[%s2164_s6 + $0x1] ss:$0 sm:$0xff]  ;;  %v378_v33 = vld [vmem:[%s2160_s2] sm:$0x1]  ;;  %v1410_v36 = vld [vmem:[%s2164_s6 + $0x2] ss:$0 sm:$0xff]  ;;  %v1988_v58 = vpack.c.bf16 %v49_v57, %v48_v55 }
   0xa   :  { %1611 = vmatprep.subr.bf16.mxu0 %v1809_v2  ;;  %v1417_v42 = vld [vmem:[%s2161_s3] ss:$0 sm:$0xff]  ;;  %v1418_v60 = vld [vmem:[%s2160_s2 + $0x1] ss:$0 sm:$0xff]  ;;  %v2015_v3 = vld [vmem:[%s2164_s6 + $0x3] sm:$0x1] }
   0xb   :  { %v47_v54 = vld [vmem:[%s2162_s4 + $0x20] sm:$0xff]  ;;  %s1816_s4 = smov 80  }
   0xc   :  { %1607 = vmatpush3.bf16.msra.mxu1 %v1606_v11  ;;  %v1982_v56 = vpack.c.bf16 %v47_v54, %v46_v53 }
   0xd   :  { %1514 = vmatprep.subr.mxu1 %v1812_v4  ;;  %1613 = vmatpush3.bf16.msra.mxu0 %v1612_v23 }
   0xe   :  { %1614 = vmatprep.subr.bf16.mxu0 %v1809_v2 }
  0xda   :  { %v134_v13 = vpop.f32.mrb[0].mxu1 }
  0xdb   :  { %v135_v14 = vadd.f32 %v1403_v12, %v134_v13  ;;  %v1491_v15 = vpop.f32.mrb[1].mxu1 }
  0xdd   :  { %1669 = vtanh.f32 %v135_v14  ;;  %v1421_v14 = vld [vmem:[%s2161_s3 + $0x1] ss:$0 sm:$0xff] }
  0xe7   :  { %v1670_v16 = vpop.eup %1669 }
  0xe8   :  { %1501 = vmatmul.mubr.msk.f32.vlgmr.msra.gmra.mrb[2].mxu1 %vm143_vm5, %v1670_v16 }
  0xe9   :  { %1516 = vmatprep.mubr.msk.f32.mxu1 %vm1811_vm3, %v1812_v4  ;;  %1515 = vmatpush3.msk.msra.mxu1 %vm304_vm6, %v43_v22 }
  0xea   :  { %1617 = vmatprep.subr.bf16.mxu1 %v1809_v2 }
  0xec   :  { %1517 = vmatmul.mubr.msk.f32.vlgmr.msra.gmra.mrb[4].mxu1 %vm300_vm7, %v295_v24 }
  0xed   :  { %1534 = vmatprep.mubr.msk.f32.mxu1 %vm1811_vm3, %v1812_v4  ;;  %1619 = vmatpush3.bf16.msra.mxu1 %v1982_v56 }
  0xee   :  { %1620 = vmatprep.subr.bf16.mxu1 %v1809_v2 }
  0xf1   :  { %1622 = vmatpush3.bf16.msra.mxu1 %v1988_v58 }
  0xf2   :  { %1632 = vmatprep.subr.bf16.mxu1 %v1809_v2 }
 0x1bb   :  { %v213_v26 = vpop.f32.mrb[2].mxu1 }
 0x1bc   :  { %v214_v27 = vadd.f32 %v1406_v25, %v213_v26  ;;  %v1502_v28 = vpop.f32.mrb[3].mxu1 }
 0x1be   :  { %1671 = vtanh.f32 %v214_v27 }
 0x1bf   :  { %v374_v34 = vpop.f32.mrb[4].mxu1 }
 0x1c0   :  { %v1518_v35 = vpop.f32.mrb[5].mxu1  ;;  %v1961_v37 = vadd.f32 %v1410_v36, %v374_v34 }
 0x1c8   :  { %v1672_v32 = vpop.eup %1671 }
 0x1c9   :  { %1512 = vmatmul.mubr.msk.f32.vlgmr.msra.gmra.mrb[0].mxu0 %vm143_vm5, %v1672_v32 }
 0x1ca   :  { %1616 = vmatpush3.bf16.msra.mxu0 %v1943_v31  ;;  %1523 = vmatprep.mubr.msk.f32.mxu0 %vm1811_vm3, %v1812_v4 }
 0x1cb   :  { %1623 = vmatprep.subr.bf16.mxu0 %v1809_v2 }
 0x1cd   :  { %1524 = vmatmul.mubr.msk.f32.vlgmr.msra.gmra.mrb[2].mxu0 %vm384_vm8, %v378_v33 }
 0x1ce   :  { %1625 = vmatpush3.bf16.msra.mxu0 %v1943_v31  ;;  %1541 = vmatprep.mubr.msk.f32.mxu0 %vm1811_vm3, %v1812_v4 }
 0x1cf   :  { %1626 = vmatprep.subr.bf16.mxu0 %v1809_v2 }
 0x2a0   :  { %v454_v38 = vpop.f32.mrb[2].mxu0 }
 0x2a1   :  { %v458_v39 = vadd.f32 %v454_v38, %v1961_v37  ;;  %v1525_v40 = vpop.f32.mrb[3].mxu0 }
 0x2a3   :  { %1673 = vtanh.f32 %v458_v39  ;;  %v1416_v43 = vmul.f32 -1.442695, %v458_v39 }
 0x2a5   :  { %1675 = vpow2.f32 %v1416_v43 }
 0x2ad   :  { %v1674_v41 = vpop.eup %1673 }
 0x2ae   :  { %476 = vrot.lane.b32.xlu0 %v1674_v41, %s1813_s23 }
 0x2af   :  { %v1676_v44 = vpop.eup %1675 }
 0x2b0   :  { %v462_v45 = vadd.f32 1.0, %v1676_v44 }
 0x2b2   :  { %471 = vrot.lane.b32.xlu0 %v1417_v42, %s1814_s26  ;;  %1677 = vrcp.f32 %v462_v45 }
 0x2bc   :  { %v1678_v46 = vpop.eup %1677 }
 0x320   :  { %v477_v47 = vpop.permute.xlu0 %476 }
 0x321   :  { %v479_v48 = vmul.f32 %v1678_v46, %v477_v47 }
 0x323   :  { %481 = vrot.lane.b32.xlu1 %v479_v48, %s1814_s26 }
 0x324   :  { %v472_v49 = vpop.permute.xlu0 %471 }
 0x325   :  { %v474_v50 = vmul.f32 %v1678_v46, %v472_v49 }
 0x395   :  { %v482_v51 = vpop.permute.xlu1 %481 }
 0x396   :  { %v1970_v52 = vadd.f32 %v482_v51, %v474_v50 }
 0x398   :  { %1679 = vtanh.f32 %v1970_v52  ;;  %v693_v28 = vrot.slane %v1970_v52, 7 }
 0x3a2   :  { %v1680_v59 = vpop.eup %1679 }
 0x3a3   :  { %487 = vrot.lane.b32.xlu1 %v1680_v59, %s1815_s14 }
 0x3a7   :  { %500 = vrot.lane.b32.xlu1 %v1418_v60, %s1814_s26 }
 0x415   :  { %v488_v61 = vpop.permute.xlu1 %487 }
 0x416   :  { %v490_v62 = vmul.f32 %v1678_v46, %v488_v61 }
 0x418   :  { %492 = vrot.lane.b32.xlu0 %v490_v62, %s1816_s4 }
 0x419   :  { %v501_v63 = vpop.permute.xlu1 %500 }
 0x48a   :  { %v493_v0 = vpop.permute.xlu0 %492 }
 0x48b   :  { %v503_v1 = vsel %vm384_vm8, %v493_v0, %v501_v63  ;;  %1542 = vmatmul.mubr.msk.f32.vlgmr.msra.gmra.mrb[4].mxu0 %vm384_vm8, %v493_v0 }
 0x48c   :  { %1535 = vmatmul.mubr.msk.f32.vlgmr.msra.gmra.mrb[6].mxu1 %vm143_vm5, %v503_v1  ;;  %1628 = vmatpush3.bf16.msra.mxu0 %v1982_v56 }
 0x48d   :  { %1629 = vmatprep.subr.bf16.mxu0 %v1809_v2  ;;  %1634 = vmatpush3.bf16.msra.mxu1 %v1943_v31 }
 0x48e   :  { %1552 = vmatprep.mubr.msk.f32.mxu0 %vm1811_vm3, %v1812_v4  ;;  %1559 = vmatprep.mubr.msk.f32.mxu1 %vm1811_vm3, %v1812_v4 }
 0x48f   :  { %1635 = vmatprep.subr.bf16.mxu1 %v1809_v2 }
 0x490   :  { %1631 = vmatpush3.bf16.msra.mxu0 %v1988_v58 }
 0x491   :  { %1641 = vmatprep.subr.bf16.mxu0 %v1809_v2 }
 0x55e   :  { %v677_v5 = vpop.f32.mrb[4].mxu0 }
 0x55f   :  { %v682_v6 = vrot.slane %v677_v5, 7  ;;  %v573_v7 = vpop.f32.mrb[6].mxu1  ;;  %v1543_v8 = vpop.f32.mrb[5].mxu0 }
 0x560   :  { %v574_v9 = vadd.f32 %v573_v7, %v2015_v3  ;;  %v1536_v10 = vpop.f32.mrb[7].mxu1 }
 0x561   :  { %v684_v11 = vadd.f32 %v682_v6, %v1961_v37 }
 0x562   :  { %1681 = vtanh.f32 %v574_v9  ;;  %v1420_v15 = vmul.f32 -1.442695, %v574_v9 }
 0x563   :  { %1683 = vtanh.f32 %v684_v11  ;;  %v1423_v16 = vmul.f32 -1.442695, %v684_v11 }
 0x564   :  { %1685 = vpow2.f32 %v1420_v15 }
 0x565   :  { %1687 = vpow2.f32 %v1423_v16 }
 0x56c   :  { %v1682_v12 = vpop.eup %1681 }
 0x56d   :  { %v1684_v13 = vpop.eup %1683  ;;  %594 = vrot.lane.b32.xlu0 %v1682_v12, %s1813_s23 }
 0x56e   :  { %697 = vrot.lane.b32.xlu1 %v1684_v13, %s1813_s23  ;;  %v1686_v17 = vpop.eup %1685 }
 0x56f   :  { %v1688_v18 = vpop.eup %1687  ;;  %v580_v19 = vadd.f32 1.0, %v1686_v17 }
 0x570   :  { %v688_v20 = vadd.f32 1.0, %v1688_v18 }
 0x571   :  { %589 = vrot.lane.b32.xlu0 %v1421_v14, %s1814_s26  ;;  %1689 = vrcp.f32 %v580_v19 }
 0x572   :  { %1691 = vrcp.f32 %v688_v20 }
 0x57b   :  { %v1690_v21 = vpop.eup %1689 }
 0x57c   :  { %v1692_v23 = vpop.eup %1691 }
 0x57d   :  { %v695_v32 = vmul.f32 %v1692_v23, %v693_v28 }
 0x5df   :  { %v595_v22 = vpop.permute.xlu0 %594 }
 0x5e0   :  { %v597_v24 = vmul.f32 %v1690_v21, %v595_v22  ;;  %v698_v25 = vpop.permute.xlu1 %697 }
 0x5e1   :  { %v700_v26 = vmul.f32 %v1692_v23, %v698_v25 }
 0x5e2   :  { %599 = vrot.lane.b32.xlu1 %v597_v24, %s1814_s26 }
 0x5e3   :  { %702 = vrot.lane.b32.xlu0 %v700_v26, %s1814_s26  ;;  %v590_v27 = vpop.permute.xlu0 %589 }
 0x5e4   :  { %v592_v29 = vmul.f32 %v1690_v21, %v590_v27 }
 0x654   :  { %v600_v30 = vpop.permute.xlu1 %599 }
 0x655   :  { %v2028_v33 = vadd.f32 %v600_v30, %v592_v29  ;;  %v703_v34 = vpop.permute.xlu0 %702 }
 0x656   :  { %v2030_v35 = vadd.f32 %v703_v34, %v695_v32 }
 0x657   :  { %1693 = vtanh.f32 %v2028_v33 }
 0x658   :  { %1695 = vtanh.f32 %v2030_v35  ;;  %v907_v12 = vrot.slane %v2030_v35, 7 }
 0x661   :  { %v1694_v36 = vpop.eup %1693 }
 0x662   :  { %v1696_v38 = vpop.eup %1695  ;;  %605 = vrot.lane.b32.xlu1 %v1694_v36, %s1815_s14 }
 0x663   :  { %708 = vrot.lane.b32.xlu0 %v1696_v38, %s1815_s14 }
 0x6d4   :  { %v606_v39 = vpop.permute.xlu1 %605 }
 0x6d5   :  { %v2036_v40 = vmul.f32 %v1690_v21, %v606_v39  ;;  %v709_v41 = vpop.permute.xlu0 %708 }
 0x6d6   :  { %v711_v42 = vmul.f32 %v1692_v23, %v709_v41 }
 0x6d7   :  { %v717_v43 = vrot.slane %v2036_v40, 7 }
 0x6d8   :  { %713 = vrot.lane.b32.xlu1 %v711_v42, %s1816_s4  ;;  %v820_v44 = vrot.slane %v711_v42, 1 }
 0x6d9   :  { %718 = vrot.lane.b32.xlu0 %v717_v43, %s1813_s23 }
 0x6dc   :  { %821 = vrot.lane.b32.xlu1 %v820_v44, %s1816_s4 }
 0x74a   :  { %v714_v45 = vpop.permute.xlu1 %713 }
 0x74b   :  { %v719_v46 = vpop.permute.xlu0 %718 }
 0x74c   :  { %v721_v47 = vsel %vm384_vm8, %v714_v45, %v719_v46 }
 0x74d   :  { %v723_v48 = vrot.slane %v721_v47, 1 }
 0x74e   :  { %v822_v49 = vpop.permute.xlu1 %821 }
 0x74f   :  { %1553 = vmatmul.mubr.msk.f32.vlgmr.msra.gmra.mrb[6].mxu0 %vm143_vm5, %v723_v48  ;;  %1560 = vmatmul.mubr.msk.f32.vlgmr.msra.gmra.mrb[8].mxu1 %vm384_vm8, %v822_v49 }
 0x750   :  { %1637 = vmatpush3.bf16.msra.mxu1 %v1982_v56  ;;  %1643 = vmatpush3.bf16.msra.mxu0 %v1943_v31 }
 0x751   :  { %1638 = vmatprep.subr.bf16.mxu1 %v1809_v2  ;;  %1570 = vmatprep.mubr.msk.f32.mxu1 %vm1811_vm3, %v1812_v4 }
 0x752   :  { %1577 = vmatprep.mubr.msk.f32.mxu0 %vm1811_vm3, %v1812_v4  ;;  %1644 = vmatprep.subr.bf16.mxu0 %v1809_v2 }
 0x754   :  { %1640 = vmatpush3.bf16.msra.mxu1 %v1988_v58 }
 0x822   :  { %v792_v50 = vpop.f32.mrb[6].mxu0  ;;  %v891_v51 = vpop.f32.mrb[8].mxu1 }
 0x823   :  { %v793_v52 = vadd.f32 %v792_v50, %v2015_v3  ;;  %v896_v53 = vrot.slane %v891_v51, 6  ;;  %v1554_v54 = vpop.f32.mrb[7].mxu0  ;;  %v1561_v55 = vpop.f32.mrb[9].mxu1 }
 0x825   :  { %1697 = vtanh.f32 %v793_v52  ;;  %v898_v31 = vadd.f32 %v896_v53, %v1961_v37  ;;  %v1425_v60 = vmul.f32 -1.442695, %v793_v52 }
 0x827   :  { %1699 = vtanh.f32 %v898_v31  ;;  %v1427_v61 = vmul.f32 -1.442695, %v898_v31 }
 0x828   :  { %1701 = vpow2.f32 %v1425_v60 }
 0x829   :  { %1703 = vpow2.f32 %v1427_v61 }
 0x82f   :  { %v1698_v57 = vpop.eup %1697 }
 0x830   :  { %805 = vrot.lane.b32.xlu0 %v1698_v57, %s1813_s23 }
 0x831   :  { %v1700_v59 = vpop.eup %1699 }
 0x832   :  { %911 = vrot.lane.b32.xlu1 %v1700_v59, %s1813_s23  ;;  %v1702_v62 = vpop.eup %1701 }
 0x833   :  { %v1704_v63 = vpop.eup %1703  ;;  %v799_v0 = vadd.f32 1.0, %v1702_v62 }
 0x834   :  { %v902_v1 = vadd.f32 1.0, %v1704_v63 }
 0x835   :  { %1705 = vrcp.f32 %v799_v0 }
 0x836   :  { %1707 = vrcp.f32 %v902_v1 }
 0x83f   :  { %v1706_v5 = vpop.eup %1705 }
 0x840   :  { %v1708_v8 = vpop.eup %1707  ;;  %v803_v11 = vmul.f32 %v1706_v5, %v2028_v33 }
 0x841   :  { %v909_v15 = vmul.f32 %v1708_v8, %v907_v12 }
 0x8a2   :  { %v806_v6 = vpop.permute.xlu0 %805 }
 0x8a3   :  { %v808_v7 = vmul.f32 %v1706_v5, %v806_v6 }
 0x8a4   :  { %v912_v9 = vpop.permute.xlu1 %911 }
 0x8a5   :  { %810 = vrot.lane.b32.xlu0 %v808_v7, %s1814_s26  ;;  %v914_v10 = vmul.f32 %v1708_v8, %v912_v9 }
 0x8a7   :  { %916 = vrot.lane.b32.xlu1 %v914_v10, %s1814_s26 }
 0x917   :  { %v811_v13 = vpop.permute.xlu0 %810 }
 0x918   :  { %v813_v14 = vadd.f32 %v811_v13, %v803_v11 }
 0x919   :  { %v917_v16 = vpop.permute.xlu1 %916 }
 0x91a   :  { %1709 = vtanh.f32 %v813_v14  ;;  %v2062_v17 = vadd.f32 %v917_v16, %v909_v15 }
 0x91c   :  { %1711 = vtanh.f32 %v2062_v17  ;;  %v1121_v52 = vrot.slane %v2062_v17, 7 }
 0x924   :  { %v1710_v18 = vpop.eup %1709 }
 0x925   :  { %816 = vrot.lane.b32.xlu0 %v1710_v18, %s1815_s14 }
 0x926   :  { %v1712_v19 = vpop.eup %1711 }
 0x927   :  { %922 = vrot.lane.b32.xlu1 %v1712_v19, %s1815_s14 }
 0x997   :  { %v817_v20 = vpop.permute.xlu0 %816 }
 0x998   :  { %v2067_v21 = vmul.f32 %v1706_v5, %v817_v20 }
 0x999   :  { %v923_v23 = vpop.permute.xlu1 %922 }
 0x99a   :  { %v931_v22 = vrot.slane %v2067_v21, 6  ;;  %v925_v24 = vmul.f32 %v1708_v8, %v923_v23  ;;  %v1248_v61 = vrot.slane %v2067_v21, 7 }
 0x99c   :  { %932 = vrot.lane.b32.xlu1 %v931_v22, %s1813_s23  ;;  %927 = vrot.lane.b32.xlu0 %v925_v24, %s1816_s4  ;;  %v1034_v25 = vrot.slane %v925_v24, 2  ;;  %v1256_v7 = vsel %vm1255_vm9, %v2036_v40, %v1248_v61  ;;  %v42_v24 = vld [vmem:[%s2163_s5 + $0x58] sm:$0xff] }
 0x9a0   :  { %1035 = vrot.lane.b32.xlu0 %v1034_v25, %s1816_s4 }
 0xa0e   :  { %v933_v26 = vpop.permute.xlu1 %932  ;;  %v928_v27 = vpop.permute.xlu0 %927 }
 0xa0f   :  { %v935_v28 = vsel %vm384_vm8, %v928_v27, %v933_v26 }
 0xa10   :  { %v937_v29 = vrot.slane %v935_v28, 2 }
 0xa12   :  { %v1036_v30 = vpop.permute.xlu0 %1035  ;;  %1571 = vmatmul.mubr.msk.f32.vlgmr.msra.gmra.mrb[10].mxu1 %vm143_vm5, %v937_v29 }
 0xa13   :  { %1578 = vmatmul.mubr.msk.f32.vlgmr.msra.gmra.mrb[8].mxu0 %vm384_vm8, %v1036_v30 }
 0xa14   :  { %1646 = vmatpush3.bf16.msra.mxu0 %v1982_v56  ;;  %1588 = vmatprep.mubr.msk.f32.mxu0 %vm1811_vm3, %v1812_v4 }
 0xa15   :  { %1647 = vmatprep.subr.bf16.mxu0 %v1809_v2 }
 0xa18   :  { %1649 = vmatpush3.bf16.msra.mxu0 %v1988_v58 }
 0xa19   :  { %1650 = vmatprep.subr.bf16.mxu0 %v1809_v2 }
 0xae5   :  { %v1006_v32 = vpop.f32.mrb[10].mxu1 }
 0xae6   :  { %v1007_v33 = vadd.f32 %v1006_v32, %v2015_v3  ;;  %v1572_v34 = vpop.f32.mrb[11].mxu1  ;;  %v1105_v35 = vpop.f32.mrb[8].mxu0 }
 0xae7   :  { %v1110_v36 = vrot.slane %v1105_v35, 5  ;;  %v1579_v38 = vpop.f32.mrb[9].mxu0 }
 0xae8   :  { %1713 = vtanh.f32 %v1007_v33  ;;  %v1429_v58 = vmul.f32 -1.442695, %v1007_v33 }
 0xae9   :  { %v1112_v39 = vadd.f32 %v1110_v36, %v1961_v37 }
 0xaeb   :  { %1715 = vtanh.f32 %v1112_v39  ;;  %v1431_v42 = vmul.f32 -1.442695, %v1112_v39 }
 0xaec   :  { %1717 = vpow2.f32 %v1429_v58 }
 0xaed   :  { %1719 = vpow2.f32 %v1431_v42 }
 0xaf2   :  { %v1714_v56 = vpop.eup %1713 }
 0xaf3   :  { %1019 = vrot.lane.b32.xlu1 %v1714_v56, %s1813_s23 }
 0xaf5   :  { %v1716_v41 = vpop.eup %1715 }
 0xaf6   :  { %1125 = vrot.lane.b32.xlu0 %v1716_v41, %s1813_s23  ;;  %v1718_v2 = vpop.eup %1717 }
 0xaf7   :  { %v1720_v43 = vpop.eup %1719  ;;  %v1013_v44 = vadd.f32 1.0, %v1718_v2 }
 0xaf8   :  { %v1116_v45 = vadd.f32 1.0, %v1720_v43 }
 0xaf9   :  { %1721 = vrcp.f32 %v1013_v44 }
 0xafa   :  { %1723 = vrcp.f32 %v1116_v45 }
 0xb03   :  { %v1722_v46 = vpop.eup %1721 }
 0xb04   :  { %v1724_v48 = vpop.eup %1723  ;;  %v1017_v51 = vmul.f32 %v1722_v46, %v813_v14 }
 0xb05   :  { %v1123_v55 = vmul.f32 %v1724_v48, %v1121_v52 }
 0xb65   :  { %v1020_v47 = vpop.permute.xlu1 %1019 }
 0xb66   :  { %v1022_v37 = vmul.f32 %v1722_v46, %v1020_v47 }
 0xb68   :  { %v1126_v49 = vpop.permute.xlu0 %1125  ;;  %1024 = vrot.lane.b32.xlu1 %v1022_v37, %s1814_s26 }
 0xb69   :  { %v1128_v50 = vmul.f32 %v1724_v48, %v1126_v49 }
 0xb6b   :  { %1130 = vrot.lane.b32.xlu0 %v1128_v50, %s1814_s26 }
 0xbda   :  { %v1025_v53 = vpop.permute.xlu1 %1024 }
 0xbdb   :  { %v1027_v54 = vadd.f32 %v1025_v53, %v1017_v51 }
 0xbdd   :  { %1725 = vtanh.f32 %v1027_v54  ;;  %v1131_v31 = vpop.permute.xlu0 %1130 }
 0xbde   :  { %v1133_v57 = vadd.f32 %v1131_v31, %v1123_v55 }
 0xbe0   :  { %1727 = vtanh.f32 %v1133_v57 }
 0xbe7   :  { %v1726_v59 = vpop.eup %1725 }
 0xbe8   :  { %1030 = vrot.lane.b32.xlu1 %v1726_v59, %s1815_s14 }
 0xbea   :  { %v1728_v60 = vpop.eup %1727 }
 0xbeb   :  { %1136 = vrot.lane.b32.xlu0 %v1728_v60, %s1815_s14 }
 0xc5a   :  { %v1031_v62 = vpop.permute.xlu1 %1030 }
 0xc5b   :  { %v1033_v63 = vmul.f32 %v1722_v46, %v1031_v62 }
 0xc5d   :  { %v1145_v0 = vrot.slane %v1033_v63, 5  ;;  %v1250_v1 = vrot.slane %v1033_v63, 6  ;;  %v1137_v5 = vpop.permute.xlu0 %1136 }
 0xc5e   :  { %v1139_v6 = vmul.f32 %v1724_v48, %v1137_v5 }
 0xc5f   :  { %1146 = vrot.lane.b32.xlu0 %v1145_v0, %s1813_s23  ;;  %v1257_v8 = vsel %vm64_vm0, %v1256_v7, %v1250_v1 }
 0xc60   :  { %1141 = vrot.lane.b32.xlu1 %v1139_v6, %s1816_s4 }
 0xcd1   :  { %v1147_v9 = vpop.permute.xlu0 %1146 }
 0xcd2   :  { %v1142_v10 = vpop.permute.xlu1 %1141 }
 0xcd3   :  { %v1149_v11 = vsel %vm384_vm8, %v1142_v10, %v1147_v9  ;;  %1340 = vst.msk [vmem:[#allocation4 - $0x3] sm:$0x8] %vm1339_vm10, %v1142_v10 }
 0xcd4   :  { %v1151_v12 = vrot.slane %v1149_v11, 3 }
 0xcd6   :  { %1589 = vmatmul.mubr.msk.f32.vlgmr.msra.gmra.mrb[10].mxu0 %vm143_vm5, %v1151_v12 }
 0xcd7   :  { %1595 = vmatprep.mubr.msk.f32.mxu0 %vm1811_vm3, %v1812_v4 }
 0xda9   :  { %v1220_v40 = vpop.f32.mrb[10].mxu0 }
 0xdaa   :  { %v1221_v13 = vadd.f32 %v1220_v40, %v2015_v3  ;;  %v1590_v14 = vpop.f32.mrb[11].mxu0  ;;  %v41_v3 = vld [vmem:[%s2163_s5 + $0x50] sm:$0xff]  ;;  %s1818_s5 = smov [#allocation4]  }
 0xdab   :  { %v1651_v25 = vpack.c.bf16 %v42_v24, %v41_v3  ;;  %s1373_s22 = sshll.u32 %s1818_s5, 4  ;;  %s1374_s22 = int_to_ptr.vmem [resolvable:$true] %s1373_s22 }
 0xdac   :  { %1729 = vtanh.f32 %v1221_v13  ;;  %v1433_v16 = vmul.f32 -1.442695, %v1221_v13  ;;  %p1744_p1 = scmp.lt.s32.totalorder %s1374_s22, %s1374_s22 }
 0xdad   :  { %1652 = vmatpush3.bf16.msra.mxu0 %v1651_v25 }
 0xdae   :  { %1731 = vpow2.f32 %v1433_v16 }
 0xdb6   :  { %v1730_v15 = vpop.eup %1729 }
 0xdb7   :  { %1233 = vrot.lane.b32.xlu1 %v1730_v15, %s1813_s23  ;;  %s1739_s23 = scalar_lea.vmem %s1374_s22, 32 }
 0xdb8   :  { %v1732_v17 = vpop.eup %1731  ;;  %p1740_p0 = scmp.ne.s32.totalorder %s1374_s22, %s1739_s23  ;;  %p1745_p2 = scmp.lt.s32.totalorder %s1739_s23, %s1739_s23 }
 0xdb9   :  { %v1227_v18 = vadd.f32 1.0, %v1732_v17 }
 0xdba   :  { %p1746_p3 = por %p1745_p2, %p1744_p1 }
 0xdbb   :  { %1733 = vrcp.f32 %v1227_v18 }
 0xdbc   :  { %p1747_p4 = pnand %p1746_p3, %p1740_p0 }
 0xdc5   :  { %v1734_v19 = vpop.eup %1733 }
 0xdc6   :  { %v1231_v22 = vmul.f32 %v1734_v19, %v1027_v54 }
 0xe29   :  { %v1234_v20 = vpop.permute.xlu1 %1233 }
 0xe2a   :  { %v1236_v21 = vmul.f32 %v1734_v19, %v1234_v20 }
 0xe2c   :  { %1238 = vrot.lane.b32.xlu0 %v1236_v21, %s1814_s26 }
 0xe9e   :  { %v1239_v4 = vpop.permute.xlu0 %1238 }
 0xe9f   :  { %v1241_v23 = vadd.f32 %v1239_v4, %v1231_v22 }
 0xea1   :  { %1735 = vtanh.f32 %v1241_v23 }
 0xeab   :  { %v1736_v26 = vpop.eup %1735 }
 0xeac   :  { %1244 = vrot.lane.b32.xlu1 %v1736_v26, %s1815_s14 }
 0xf1e   :  { %v1245_v27 = vpop.permute.xlu1 %1244 }
 0xf1f   :  { %v1247_v28 = vmul.f32 %v1734_v19, %v1245_v27 }
 0xf21   :  { %v1253_v29 = vrot.slane %v1247_v28, 5  ;;  %1341 = vrot.lane.b32.xlu1 %v1247_v28, %s1816_s4 }
 0xf23   :  { %v1259_v30 = vsel %vm1258_vm11, %v1257_v8, %v1253_v29 }
 0xf24   :  { %1261 = vrot.lane.b32.xlu0 %v1259_v30, %s1816_s4 }
 0xf25   :  { %1353 = vrot.lane.b32.xlu1 %v1241_v23, %s1817_s21 }
 0xf28   :  { %1348 = vrot.lane.b32.xlu0 %v1133_v57, %s1817_s21 }
 0xf93   :  { %v1342_v32 = vpop.permute.xlu1 %1341 }
 0xf94   :  { %1346 = vst.msk [vmem:[#allocation4 + $0x1] sm:$0x1] %vm1345_vm12, %v1342_v32 }
 0xf96   :  { %v1262_v33 = vpop.permute.xlu0 %1261 }
 0xf97   :  { %v1354_v34 = vpop.permute.xlu1 %1353  ;;  %1596 = vmatmul.mubr.msk.f32.vlgmr.msra.gmra.mrb[0].mxu0 %vm384_vm8, %v1262_v33 }
 0xf98   :  { %1357 = vst.msk [vmem:[#allocation6 + $0x1] sm:$0x1] %vm1345_vm12, %v1354_v34 }
 0xf9a   :  { %v1349_v35 = vpop.permute.xlu0 %1348 }
 0xf9b   :  { %1351 = vst.msk [vmem:[#allocation6 - $0x3] sm:$0x8] %vm1339_vm10, %v1349_v35 }
 0xf9c   :  { %1750 = shalt.err (!%p1747_p4)
}
 0xf9d   :  { %s1751_s27 = scalar_lea.hbm %s2166_s8, 32 }
 0xf9e   :  { %p1752_p5 = scmp.ne.s32.totalorder %s2166_s8, %s1751_s27  ;;  %p1755_p6 = scmp.lt.u32.totalorder %s1751_s27, %s2166_s8 }
 0xfa0   :  { %p1757_p7 = pnand %p1755_p6, %p1752_p5 }
 0xfa2   :  { %1760 = shalt.err (!%p1757_p7)
}
 0xfa3   :  { %s1819_s11 = smov 1   ;;  %s1820_s14 = smov [#allocation6]  }
 0xfa4   :  { %1379 = dma.vmem_to_hbm [thread:$0]  %s1374_s22, 32, %s2166_s8, [#allocation5], %s1814_s26, %s1814_s26, %s1819_s11  }
 0xfa5   :  { %s1385_s15 = sshll.u32 %s1820_s14, 4  ;;  %s1386_s15 = int_to_ptr.vmem [resolvable:$true] %s1385_s15 }
 0xfa6   :  { %s1761_s16 = scalar_lea.vmem %s1386_s15, 32  ;;  %p1766_p9 = scmp.lt.s32.totalorder %s1386_s15, %s1386_s15 }
 0xfa7   :  { %p1762_p8 = scmp.ne.s32.totalorder %s1386_s15, %s1761_s16  ;;  %p1767_p10 = scmp.lt.s32.totalorder %s1761_s16, %s1761_s16 }
 0xfa9   :  { %p1768_p11 = por %p1767_p10, %p1766_p9 }
 0xfab   :  { %p1769_p12 = pnand %p1768_p11, %p1762_p8 }
 0xfad   :  { %1772 = shalt.err (!%p1769_p12)
}
 0xfae   :  { %s1773_s17 = scalar_lea.hbm %s2167_s9, 32 }
 0xfaf   :  { %p1774_p13 = scmp.ne.s32.totalorder %s2167_s9, %s1773_s17  ;;  %p1777_p0 = scmp.lt.u32.totalorder %s1773_s17, %s2167_s9 }
 0xfb1   :  { %p1779_p1 = pnand %p1777_p0, %p1774_p13 }
 0xfb3   :  { %1782 = shalt.err (!%p1779_p1)
}
 0xfb4   :  { %1391 = dma.vmem_to_hbm [thread:$0]  %s1386_s15, 32, %s2167_s9, [#allocation5], %s1814_s26, %s1814_s26, %s1819_s11   ;;  %vm1337_vm13 = vcmask 257024  }
 0xfb5   :  { %v1408_v36 = vld [vmem:[%s2164_s6 + $0x4] ss:$0 sm:$0xff]  ;;  %s1821_s5 = smov [#allocation2]  }
 0xfb6   :  { %s1364_s22 = sshll.u32 %s1821_s5, 4  ;;  %s1365_s22 = int_to_ptr.vmem [resolvable:$true] %s1364_s22 }
 0xfb7   :  { %s1783_s23 = scalar_lea.vmem %s1365_s22, 64  ;;  %p1788_p3 = scmp.lt.s32.totalorder %s1365_s22, %s1365_s22 }
 0xfb8   :  { %p1784_p2 = scmp.ne.s32.totalorder %s1365_s22, %s1783_s23  ;;  %p1789_p4 = scmp.lt.s32.totalorder %s1783_s23, %s1783_s23 }
 0xfba   :  { %p1790_p5 = por %p1789_p4, %p1788_p3 }
 0xfbc   :  { %p1791_p6 = pnand %p1790_p5, %p1784_p2 }
0x106a   :  { %v1331_v38 = vpop.f32.mrb[0].mxu0 }
0x106b   :  { %v1653_v39 = vadd.f32 %v1408_v36, %v1331_v38  ;;  %v1597_v56 = vpop.f32.mrb[1].mxu0 }
0x106d   :  { %1737 = vtanh.f32 %v1653_v39 }
0x1077   :  { %v1738_v41 = vpop.eup %1737 }
0x1078   :  { %1338 = vst.msk [vmem:[#allocation2] sm:$0xf] %vm1337_vm13, %v1738_v41 }
0x1079   :  { %1794 = shalt.err (!%p1791_p6)
}
0x107a   :  { %s1795_s6 = scalar_lea.hbm %s2165_s7, 64 }
0x107b   :  { %p1796_p7 = scmp.ne.s32.totalorder %s2165_s7, %s1795_s6  ;;  %p1799_p8 = scmp.lt.u32.totalorder %s1795_s6, %s2165_s7 }
0x107d   :  { %p1801_p9 = pnand %p1799_p8, %p1796_p7 }
0x107f   :  { %1804 = shalt.err (!%p1801_p9)
}
0x1080   :  { %1367 = dma.vmem_to_hbm [thread:$0]  %s1365_s22, 64, %s2165_s7, [#allocation3]  }
0x1081   :  { %1805 = dma.done.wait [#allocation3], 64  }
0x1082   :  { %1806 = vsyncadd [#allocation3], 4294967232 }
0x1083   :  { %1807 = dma.done.wait [#allocation5], 64  }
0x1084   :  { %1808 = vsyncadd [#allocation5], 4294967232 }
0x1085   :  { %1401 = vsyncpa [#allocation3], 1 }
0x1086   :  { %1402 = vsyncpa [#allocation5], 1 }

</bundles_post_ra>
